<compile_context>
chip_gen: v5e
topology: v5e:2x2
jax: 0.10.0
libtpu: 0.0.40
codegen_flags: <defaults>
</compile_context>

<pallas_src>
import functools

import jax
import jax.numpy as jnp
from jax.experimental import pallas as pl
from jax.experimental.pallas import tpu as pltpu


_TILE_DST = 256    # dst-row tile of the attention kernel ("parallel" axis)
_TILE_SRC = 512    # src-column tile (softmax reduction axis, last grid dim)
_TILE_PROJ = 256   # row tile of the projection kernel
_LANE = 128
# Plain Python float (NOT a jnp scalar): avoids the kernel capturing a device
# constant, and folds to an immediate in the lowered code.
_NEG_INF = -1e30


def _round_up(x, m):
    return (x + m - 1) // m * m


# ---------------------------------------------------------------------------
# Kernel 1: feature projection + attention logits.
# ---------------------------------------------------------------------------
def _gat_proj_kernel(x_ref, w_ref, a_src_ref, a_dst_ref, h_ref, s_ref, t_ref):
    # bf16 operands, f32 accumulation on the MXU.
    h = jnp.dot(x_ref[...], w_ref[...], preferred_element_type=jnp.float32)
    # Per-node attention scalars as VPU multiply + lane reduction (XLU),
    # instead of 1-wide matmuls through the MXU result FIFO.
    s_ref[...] = jnp.sum(h * a_src_ref[...], axis=-1, keepdims=True)
    t_ref[...] = jnp.sum(h * a_dst_ref[...], axis=-1, keepdims=True)
    h_ref[...] = h.astype(jnp.bfloat16)


def _gat_project(x_bf16, w_bf16, a_src, a_dst, *, tile_rows):
    n_pad, fin_pad = x_bf16.shape
    f_pad = w_bf16.shape[1]
    grid = (n_pad // tile_rows,)
    cost = pl.CostEstimate(
        flops=2 * n_pad * fin_pad * f_pad + 4 * n_pad * f_pad,
        transcendentals=0,
        bytes_accessed=(n_pad * fin_pad * 2 + fin_pad * f_pad * 2
                        + n_pad * f_pad * 2 + 2 * n_pad * 4))
    return pl.pallas_call(
        _gat_proj_kernel,
        out_shape=(
            jax.ShapeDtypeStruct((n_pad, f_pad), jnp.bfloat16),   # h
            jax.ShapeDtypeStruct((n_pad, 1), jnp.float32),        # s (src term)
            jax.ShapeDtypeStruct((n_pad, 1), jnp.float32),        # t (dst term)
        ),
        grid_spec=pltpu.PrefetchScalarGridSpec(
            num_scalar_prefetch=0,
            grid=grid,
            in_specs=[
                pl.BlockSpec((tile_rows, fin_pad), lambda i: (i, 0)),
                pl.BlockSpec((fin_pad, f_pad), lambda i: (0, 0)),
                pl.BlockSpec((1, f_pad), lambda i: (0, 0)),
                pl.BlockSpec((1, f_pad), lambda i: (0, 0)),
            ],
            out_specs=(
                pl.BlockSpec((tile_rows, f_pad), lambda i: (i, 0)),
                pl.BlockSpec((tile_rows, 1), lambda i: (i, 0)),
                pl.BlockSpec((tile_rows, 1), lambda i: (i, 0)),
            ),
        ),
        compiler_params=pltpu.CompilerParams(
            dimension_semantics=("parallel",)),
        cost_estimate=cost,
    )(x_bf16, w_bf16, a_src, a_dst)


# ---------------------------------------------------------------------------
# Kernel 2: flash-style masked-softmax attention + aggregation.
# ---------------------------------------------------------------------------
def _gat_attn_kernel(s_row_ref, t_col_ref, h_ref, adj_ref, b_ref, out_ref,
                     m_sc, l_sc, acc_sc, *, apply_act):
    si = pl.program_id(1)

    @pl.when(si == 0)
    def _():
        m_sc[...] = jnp.full_like(m_sc, _NEG_INF)
        l_sc[...] = jnp.zeros_like(l_sc)
        acc_sc[...] = jnp.zeros_like(acc_sc)

    # Edge scores e[dst, src] = LeakyReLU_{0.2}(t[dst] + s[src]); s arrives
    # lane-major as a (1, tile_src) row so this is a pure VPU broadcast add.
    e = t_col_ref[...] + s_row_ref[...]
    e = jnp.where(e > 0, e, 0.2 * e)
    mask = adj_ref[...] > 0                       # int8 adjacency tile
    e = jnp.where(mask, e, _NEG_INF)

    # Online softmax accumulation over src tiles.
    m_prev = m_sc[...]
    m_new = jnp.maximum(m_prev, jnp.max(e, axis=1, keepdims=True))
    corr = jnp.exp(m_prev - m_new)
    p = jnp.where(mask, jnp.exp(e - m_new), 0.0)
    l_sc[...] = corr * l_sc[...] + jnp.sum(p, axis=1, keepdims=True)
    acc_sc[...] = corr * acc_sc[...] + jnp.dot(
        p.astype(jnp.bfloat16), h_ref[...], preferred_element_type=jnp.float32)
    m_sc[...] = m_new

    @pl.when(si == pl.num_programs(1) - 1)
    def _():
        # max() guards zero in-degree (padded rows); approx reciprocal -> EUP.
        inv_l = pl.reciprocal(jnp.maximum(l_sc[...], 1e-30), approx=True)
        out = acc_sc[...] * inv_l + b_ref[...]
        if apply_act:
            # ELU, with the exp argument clamped so the discarded where-branch
            # never generates inf.
            out = jnp.where(out > 0, out, jnp.exp(jnp.minimum(out, 0.0)) - 1.0)
        out_ref[...] = out


def _gat_attend(s_row, t_col, h_bf16, adj_i8, bias, *, apply_act,
                tile_dst, tile_src):
    n_pad, f_pad = h_bf16.shape
    grid = (n_pad // tile_dst, n_pad // tile_src)
    cost = pl.CostEstimate(
        flops=2 * n_pad * n_pad * f_pad + 8 * n_pad * n_pad,
        transcendentals=n_pad * n_pad,
        bytes_accessed=(n_pad * n_pad                     # int8 adjacency
                        + n_pad * f_pad * 2               # bf16 h
                        + n_pad * f_pad * 4               # f32 out
                        + 8 * n_pad))
    kernel = functools.partial(_gat_attn_kernel, apply_act=apply_act)
    return pl.pallas_call(
        kernel,
        out_shape=jax.ShapeDtypeStruct((n_pad, f_pad), jnp.float32),
        grid_spec=pltpu.PrefetchScalarGridSpec(
            num_scalar_prefetch=0,
            grid=grid,
            in_specs=[
                pl.BlockSpec((1, tile_src), lambda di, si: (0, si)),       # s row
                pl.BlockSpec((tile_dst, 1), lambda di, si: (di, 0)),       # t col
                pl.BlockSpec((tile_src, f_pad), lambda di, si: (si, 0)),   # h
                pl.BlockSpec((tile_dst, tile_src), lambda di, si: (di, si)),  # adj
                pl.BlockSpec((1, f_pad), lambda di, si: (0, 0)),           # bias
            ],
            out_specs=pl.BlockSpec((tile_dst, f_pad), lambda di, si: (di, 0)),
            scratch_shapes=[
                pltpu.VMEM((tile_dst, 1), jnp.float32),       # m
                pltpu.VMEM((tile_dst, 1), jnp.float32),       # l
                pltpu.VMEM((tile_dst, f_pad), jnp.float32),   # acc
            ],
        ),
        compiler_params=pltpu.CompilerParams(
            dimension_semantics=("parallel", "arbitrary")),
        cost_estimate=cost,
    )(s_row, t_col, h_bf16, adj_i8, bias)


# ---------------------------------------------------------------------------
# Layer / network wrappers.
# ---------------------------------------------------------------------------
def gat_layer(x_bf16, w_bf16, a_src, a_dst, bias, adj_i8, *, apply_act):
    n_pad = x_bf16.shape[0]
    tile_dst = min(_TILE_DST, n_pad)
    tile_src = min(_TILE_SRC, n_pad)
    tile_proj = min(_TILE_PROJ, n_pad)
    h, s_col, t_col = _gat_project(x_bf16, w_bf16, a_src, a_dst,
                                   tile_rows=tile_proj)
    # (N,1) -> (1,N) is a pure reshape (same linear order): the src attention
    # term is handed to the attention kernel lane-major, so no in-kernel
    # transpose is needed.
    s_row = s_col.reshape(1, n_pad)
    return _gat_attend(s_row, t_col, h, adj_i8, bias,
                       apply_act=apply_act, tile_dst=tile_dst,
                       tile_src=tile_src)


def init_gat_params(key, in_size, hidden_size, num_layers, out_size):
    dims = [in_size] + [hidden_size] * (num_layers - 1) + [out_size]
    params = []
    for li in range(num_layers):
        key, kw, ks, kd = jax.random.split(key, 4)
        fin, fout = dims[li], dims[li + 1]
        scale = (2.0 / (fin + fout)) ** 0.5
        w = scale * jax.random.normal(kw, (fin, fout), jnp.float32)
        a_src = 0.1 * jax.random.normal(ks, (1, fout), jnp.float32)
        a_dst = 0.1 * jax.random.normal(kd, (1, fout), jnp.float32)
        b = jnp.zeros((1, fout), jnp.float32)
        params.append((w, a_src, a_dst, b))
    return params


def gat_forward(x, adj, params):
    """Padded, tiled GAT forward.  x: (N, Fin) f32.  adj[dst, src] > 0 => edge."""
    n = x.shape[0]
    n_pad = _round_up(n, max(_TILE_SRC, _TILE_DST, _TILE_PROJ))

    # int8 adjacency mask: 4x less HBM traffic / VMEM than f32, reused by every
    # layer.  Padded rows/cols are zero (masked out).
    adj_i8 = jnp.zeros((n_pad, n_pad), jnp.int8)
    adj_i8 = adj_i8.at[:n, :n].set((adj > 0).astype(jnp.int8))

    fin = x.shape[1]
    fin_pad = _round_up(fin, _LANE)
    h = jnp.zeros((n_pad, fin_pad), jnp.bfloat16)
    h = h.at[:n, :fin].set(x.astype(jnp.bfloat16))

    num_layers = len(params)
    out = None
    for li, (w, a_src, a_dst, b) in enumerate(params):
        fin_l, fout = w.shape
        f_pad = _round_up(fout, _LANE)
        fin_pad_l = _round_up(fin_l, _LANE)
        assert fin_pad_l == h.shape[1]
        w_p = jnp.zeros((fin_pad_l, f_pad), jnp.bfloat16)
        w_p = w_p.at[:fin_l, :fout].set(w.astype(jnp.bfloat16))
        a_s = jnp.zeros((1, f_pad), jnp.float32).at[:, :fout].set(a_src)
        a_d = jnp.zeros((1, f_pad), jnp.float32).at[:, :fout].set(a_dst)
        b_p = jnp.zeros((1, f_pad), jnp.float32).at[:, :fout].set(b)
        out = gat_layer(h, w_p, a_s, a_d, b_p, adj_i8,
                        apply_act=li < num_layers - 1)
        h = out.astype(jnp.bfloat16)   # input of the next projection
    return out[:n, :params[-1][0].shape[1]]


def gat_forward_ref(x, adj, params):
    """Pure-JAX f32 reference for correctness checking."""
    h = x
    num_layers = len(params)
    for li, (w, a_src, a_dst, b) in enumerate(params):
        hp = h @ w
        s = hp @ a_src.T
        t = hp @ a_dst.T
        e = t + s.T
        e = jnp.where(e > 0, e, 0.2 * e)
        mask = adj > 0.0
        e = jnp.where(mask, e, -1e30)
        e = e - jnp.max(e, axis=1, keepdims=True)
        p = jnp.where(mask, jnp.exp(e), 0.0)
        alpha = p / jnp.sum(p, axis=1, keepdims=True)
        out = alpha @ hp + b
        if li < num_layers - 1:
            out = jnp.where(out > 0, out, jnp.exp(jnp.minimum(out, 0.0)) - 1.0)
        h = out
    return h


def build_dense_adj(edge_index, num_nodes):
    """edge_index: (2, E) int array, row 0 = src, row 1 = dst. adj[dst, src] = 1."""
    adj = jnp.zeros((num_nodes, num_nodes), jnp.float32)
    adj = adj.at[edge_index[1], edge_index[0]].set(1.0)
    # Self-loops so every node has at least one incoming edge (the module
    # asserts against zero in-degree).
    adj = adj.at[jnp.arange(num_nodes), jnp.arange(num_nodes)].set(1.0)
    return adj


if __name__ == "__main__":
    key = jax.random.PRNGKey(0)

    # Small shapes consistent with RevGAT(in_feats, n_hidden, n_layers, n_classes).
    num_nodes = 16
    in_size = 32
    hidden_size = 32
    num_layers = 2
    out_size = 8

    key, kx = jax.random.split(key)
    x = jax.random.normal(kx, (num_nodes, in_size), jnp.float32)

    # Synthetic edge_index: bidirectional ring graph.
    src = jnp.arange(num_nodes, dtype=jnp.int32)
    dst = (src + 1) % num_nodes
    edge_index = jnp.concatenate(
        [jnp.stack([src, dst]), jnp.stack([dst, src])], axis=1)  # (2, 2N)

    adj = build_dense_adj(edge_index, num_nodes)
    params = init_gat_params(key, in_size, hidden_size, num_layers, out_size)

    out = gat_forward(x, adj, params)
    out = jax.block_until_ready(out)

    ref = gat_forward_ref(x, adj, params)
    assert out.shape == (num_nodes, out_size)
    # bf16 MXU matmuls (f32 accumulate) + EUP approx reciprocal vs. pure-f32
    # reference: allow a few-percent tolerance.
    assert jnp.allclose(out, ref, atol=5e-2, rtol=5e-2), (
        float(jnp.max(jnp.abs(out - ref))))
    assert not bool(jnp.any(jnp.isnan(out)))

    print("KERNEL_OK")
</pallas_src>

<mosaic_0001>
module attributes {stable_mosaic.version = 11 : i64} {
  func.func @_gat_proj_kernel(%arg0: i32, %arg1: memref<256x128xbf16, #tpu.memory_space<vmem>>, %arg2: memref<128x128xbf16, #tpu.memory_space<vmem>>, %arg3: memref<1x128xf32, #tpu.memory_space<vmem>>, %arg4: memref<1x128xf32, #tpu.memory_space<vmem>>, %arg5: memref<256x128xbf16, #tpu.memory_space<vmem>>, %arg6: memref<256x1xf32, #tpu.memory_space<vmem>>, %arg7: memref<256x1xf32, #tpu.memory_space<vmem>>) attributes {dimension_semantics = [#tpu.dimension_semantics<parallel>], iteration_bounds = array<i64: 2>, scalar_prefetch = 0 : i64, scratch_operands = 0 : i64, tpu.core_type = #tpu.core_type<tc>, window_params = [{transform_indices = @transform_0, window_bounds = array<i64: 256, 128>}, {pipeline_mode = #tpu.pipeline_mode<synchronous>, transform_indices = @transform_1, window_bounds = array<i64: 128, 128>}, {pipeline_mode = #tpu.pipeline_mode<synchronous>, transform_indices = @transform_2, window_bounds = array<i64: 1, 128>}, {pipeline_mode = #tpu.pipeline_mode<synchronous>, transform_indices = @transform_3, window_bounds = array<i64: 1, 128>}, {transform_indices = @transform_4, window_bounds = array<i64: 256, 128>}, {transform_indices = @transform_5, window_bounds = array<i64: 256, 1>}, {transform_indices = @transform_6, window_bounds = array<i64: 256, 1>}]} {
    %c0 = arith.constant 0 : index
    %c0_0 = arith.constant 0 : index
    %0 = vector.load %arg1[%c0, %c0_0] : memref<256x128xbf16, #tpu.memory_space<vmem>>, vector<256x128xbf16>
    %c0_1 = arith.constant 0 : index
    %c0_2 = arith.constant 0 : index
    %1 = vector.load %arg2[%c0_1, %c0_2] : memref<128x128xbf16, #tpu.memory_space<vmem>>, vector<128x128xbf16>
    %cst = arith.constant dense<0.000000e+00> : vector<256x128xf32>
    %2 = tpu.matmul %0, %1, %cst {dimension_numbers = #tpu.dot_dimension_numbers<[1], [0], [0], [1], [0, 0, 1, 1], [], []>} : vector<256x128xbf16>, vector<128x128xbf16>, vector<256x128xf32> -> vector<256x128xf32>
    %c0_3 = arith.constant 0 : index
    %c0_4 = arith.constant 0 : index
    %3 = vector.load %arg3[%c0_3, %c0_4] : memref<1x128xf32, #tpu.memory_space<vmem>>, vector<1x128xf32>
    %4 = vector.broadcast %3 : vector<1x128xf32> to vector<256x128xf32>
    %5 = arith.mulf %2, %4 : vector<256x128xf32>
    %cst_5 = arith.constant dense<0.000000e+00> : vector<256xf32>
    %6 = vector.multi_reduction <add>, %5, %cst_5 [1] : vector<256x128xf32> to vector<256xf32>
    %7 = vector.shape_cast %6 : vector<256xf32> to vector<256x1xf32>
    %c0_6 = arith.constant 0 : index
    %c0_7 = arith.constant 0 : index
    %8 = vector.load %arg6[%c0_6, %c0_7] : memref<256x1xf32, #tpu.memory_space<vmem>>, vector<256x1xf32>
    tpu.vector_store %arg6[%c0_6, %c0_7], %7 {strides = array<i32>} : memref<256x1xf32, #tpu.memory_space<vmem>>, vector<256x1xf32>,
    %c0_8 = arith.constant 0 : index
    %c0_9 = arith.constant 0 : index
    %9 = vector.load %arg4[%c0_8, %c0_9] : memref<1x128xf32, #tpu.memory_space<vmem>>, vector<1x128xf32>
    %10 = vector.broadcast %9 : vector<1x128xf32> to vector<256x128xf32>
    %11 = arith.mulf %2, %10 : vector<256x128xf32>
    %cst_10 = arith.constant dense<0.000000e+00> : vector<256xf32>
    %12 = vector.multi_reduction <add>, %11, %cst_10 [1] : vector<256x128xf32> to vector<256xf32>
    %13 = vector.shape_cast %12 : vector<256xf32> to vector<256x1xf32>
    %c0_11 = arith.constant 0 : index
    %c0_12 = arith.constant 0 : index
    %14 = vector.load %arg7[%c0_11, %c0_12] : memref<256x1xf32, #tpu.memory_space<vmem>>, vector<256x1xf32>
    tpu.vector_store %arg7[%c0_11, %c0_12], %13 {strides = array<i32>} : memref<256x1xf32, #tpu.memory_space<vmem>>, vector<256x1xf32>,
    %15 = arith.truncf %2 : vector<256x128xf32> to vector<256x128xbf16>
    %c0_13 = arith.constant 0 : index
    %c0_14 = arith.constant 0 : index
    %16 = vector.load %arg5[%c0_13, %c0_14] : memref<256x128xbf16, #tpu.memory_space<vmem>>, vector<256x128xbf16>
    tpu.vector_store %arg5[%c0_13, %c0_14], %15 {strides = array<i32>} : memref<256x128xbf16, #tpu.memory_space<vmem>>, vector<256x128xbf16>,
    return
  }
  func.func @transform_0(%arg0: i32) -> (i32, i32) {
    %c0_i32 = arith.constant 0 : i32
    %c0_i32_0 = arith.constant 0 : i32
    return %arg0, %c0_i32 : i32, i32
  }
  func.func @transform_1(%arg0: i32) -> (i32, i32) {
    %c0_i32 = arith.constant 0 : i32
    %c0_i32_0 = arith.constant 0 : i32
    %c0_i32_1 = arith.constant 0 : i32
    return %c0_i32, %c0_i32_0 : i32, i32
  }
  func.func @transform_2(%arg0: i32) -> (i32, i32) {
    %c0_i32 = arith.constant 0 : i32
    %c0_i32_0 = arith.constant 0 : i32
    %c0_i32_1 = arith.constant 0 : i32
    return %c0_i32, %c0_i32_0 : i32, i32
  }
  func.func @transform_3(%arg0: i32) -> (i32, i32) {
    %c0_i32 = arith.constant 0 : i32
    %c0_i32_0 = arith.constant 0 : i32
    %c0_i32_1 = arith.constant 0 : i32
    return %c0_i32, %c0_i32_0 : i32, i32
  }
  func.func @transform_4(%arg0: i32) -> (i32, i32) {
    %c0_i32 = arith.constant 0 : i32
    %c0_i32_0 = arith.constant 0 : i32
    return %arg0, %c0_i32 : i32, i32
  }
  func.func @transform_5(%arg0: i32) -> (i32, i32) {
    %c0_i32 = arith.constant 0 : i32
    %c0_i32_0 = arith.constant 0 : i32
    return %arg0, %c0_i32 : i32, i32
  }
  func.func @transform_6(%arg0: i32) -> (i32, i32) {
    %c0_i32 = arith.constant 0 : i32
    %c0_i32_0 = arith.constant 0 : i32
    return %arg0, %c0_i32 : i32, i32
  }
}

</mosaic_0001>

<bundles_post_ra>
// kernel: tpu_custom_call.1
= control target key start
LH: loop header
LB: loop body
LE: loop exit
PB: predicated region body
PF: predicated region fallthrough
CT: control target
= control target key end

     0   :  { %12 = vsyncpa [#allocation3], 0  ;;  %s2049_s0 = inlined_call_operand.hbm [shape: bf16[512,128], index: 0, kind: input, shape index: {}]   ;;  %s2050_s1 = inlined_call_operand.hbm [shape: bf16[128,128], index: 1, kind: input, shape index: {}]   ;;  %s2051_s2 = inlined_call_operand.vmem [shape: f32[1,128], index: 2, kind: input, shape index: {}]   ;;  %s2052_s3 = inlined_call_operand.vmem [shape: f32[1,128], index: 3, kind: input, shape index: {}]   ;;  %s2053_s4 = inlined_call_operand.hbm [shape: bf16[512,128], index: 4, kind: output, shape index: {0}]   ;;  %s2054_s5 = inlined_call_operand.vmem [shape: f32[512,1], index: 5, kind: output, shape index: {1}]   ;;  %s2055_s6 = inlined_call_operand.vmem [shape: f32[512,1], index: 6, kind: output, shape index: {2}]  }
   0x1   :  { %14 = vsyncpa [#allocation3 + $0x1], 0 }
   0x2   :  { %15 = vsyncpa [#allocation6], 0 }
   0x3   :  { %16 = vsyncpa [#allocation4], 0 }
   0x4   :  { %18 = vsyncpa [#allocation4 + $0x1], 0  ;;  %s1591_s21 = smov 0   ;;  %s1593_s22 = smov 0  }
   0x5   :  { %s1595_s23 = smov 0   ;;  %s1597_s24 = smov 0  }
   0x6 LB: > { %s1612_s25 = sadd.s32 4294967295, %s1549_s24   ;;  %s1095_s26 = sadd.s32 4294967294, %s1549_s24   ;;  %s1549_s24 = sphi %s1597_s24, %s2069_s24   ;;  %s1545_s23 = sphi %s1595_s23, %s2068_s23   ;;  %s1541_s22 = sphi %s1593_s22, %s2067_s22   ;;  %s1537_s21 = sphi %s1591_s21, %s2066_s21  }
   0x7   : > { %p44_p0 = scmp.ne.s32.totalorder %s1541_s22, %s1537_s21  ;;  %p45_p1 = scmp.eq.s32.totalorder %s1612_s25, 0 }
   0x8   : > { %p131_p2 = scmp.eq.s32.totalorder %s1612_s25, 1  ;;  %p137_p3 = scmp.eq.s32.totalorder %s1095_s26, 1 }
   0x9   : > { %p1621_p4 = por %p45_p1, %p44_p0  ;;  %p1096_p5 = scmp.ge.s32.totalorder %s1549_s24, 1 }
   0xa   : > { %p1626_p6 = por %p137_p3, %p44_p0  ;;  %p196_p7 = scmp.lt.s32.totalorder %s1549_s24, 3 }
   0xb   : > { %s207_s7 = sshll.u32 %s2050_s1, 4  ;;  %s1551_s9 = smov [#allocation5]   ;;  %s208_s7 = int_to_ptr.hbm [resolvable:$true] %s207_s7 }
   0xc   : > { %p1634_p8 = pnand %p1096_p5, %p196_p7  ;;  %s209_s10 = sshll.u32 %s1551_s9, 4  ;;  %s210_s10 = int_to_ptr.vmem [resolvable:$true] %s209_s10 }
   0xd   : > { %s1644_s11 = sadd.s32 1, %s1549_s24   ;;  %s2056_s12 = smov 64  }
   0xe   : > { %p1364_p9 = pneg %p1634_p8  ;;  %s2057_s13 = smov 4  }
   0xf   : > { %s28_s14 = ssub.s32 %s1549_s24, %s1644_s11  ;;  %s31_s15 = sadd.s32 1, %s1545_s23 }
  0x10   : > { %p1365_p10 = pnand %p1364_p9, %p45_p1  ;;  %p29_p12 = scmp.eq.s32.totalorder %s28_s14, 0 }
  0x11   : > { %p38_p13 = scmp.ne.s32.totalorder %s1545_s23, %s1541_s22  ;;  %p39_p0 = scmp.eq.s32.totalorder %s1549_s24, 0 }
  0x12   : > { %1367 = dma.hbm_to_vmem [thread:$0]  (!%p1365_p10), %s208_s7, 1024, %s210_s10, [#allocation6], %s2056_s12, %s2056_s12, %s2057_s13  }
  0x13   : > { %s1656_s16 = scalar_select %p29_p12, %s1545_s23, %s31_s15  }
  0x14   : > { %p1660_p3 = por %p131_p2, %p38_p13  ;;  %p1377_p5 = scmp.lt.s32.totalorder %s1549_s24, 2 }
  0x15   : > { %s229_s18 = sand.u32 1, %s1545_s23   ;;  %s1211_s19 = sshll.u32 %s1549_s24, 7 }
  0x16   : > { %p40_p7 = por %p39_p0, %p38_p13  ;;  %s1099_s20 = sshll.u32 %s229_s18, 7 }
  0x17   : > { %s238_s30 = scalar_lea.hbm %s2049_s0, %s1211_s19  ;;  %s233_s9 = scalar_lea.vmem [#allocation2], %s1099_s20 }
  0x18   : > { %s239_s7 = sshll.u32 %s238_s30, 4  ;;  %s241_s10 = sshll.u32 %s233_s9, 4  ;;  %s240_s7 = int_to_ptr.hbm [resolvable:$true] %s239_s7  ;;  %s242_s10 = int_to_ptr.vmem [resolvable:$true] %s241_s10 }
  0x19   : > { %p1670_p9 = pnand %p1377_p5, %p40_p7  ;;  %s230_s15 = scalar_lea.sflag [#allocation3], %s229_s18 }
  0x1a   : > { %s1449_s12 = sshra.s32 %s240_s7, 4  ;;  %s1456_s20 = scalar_lea.hbm %s2049_s0, 256  ;;  %s1450_s12 = int_to_ptr.hbm [resolvable:$true] %s1449_s12 }
  0x1b   : > { %s1451_s13 = scalar_lea.hbm %s1450_s12, 128  ;;  %p1453_p10 = pneg %p1670_p9 }
  0x1c   : > { %p1452_p2 = scmp.ne.s32.totalorder %s1450_s12, %s1451_s13  ;;  %p1457_p0 = scmp.lt.s32.totalorder %s1450_s12, %s2049_s0 }
  0x1d   : > { %p1458_p5 = scmp.lt.s32.totalorder %s1456_s20, %s1451_s13 }
  0x1e   : > { %p1454_p12 = pnand %p1453_p10, %p1452_p2 }
  0x1f   : > { %p1459_p7 = por %p1458_p5, %p1457_p0 }
  0x20   : > { %p1455_p13 = pneg %p1454_p12 }
  0x22   : > { %p1460_p11 = pnand %p1459_p7, %p1455_p13 }
  0x24   : > { %1463 = shalt.err (!%p1460_p11)
}
  0x25   : > { %s2063_s18 = smov 4   ;;  %s2064_s9 = smov 64  }
  0x26   : > { %1371 = dma.hbm_to_vmem [thread:$0]  (!%p1670_p9), %s240_s7, 2048, %s242_s10, %s230_s15, %s2064_s9, %s2064_s9, %s2063_s18  }
  0x27   : > { %253 = sbr.rel (%p1634_p8) target bundleno = 494 (0x1ee), region = 36  ;;  %s1690_s19 = sand.u32 (!%p1634_p8), 1, %s1541_s22  }
  0x28   : > { %s1103_s12 = sshll.u32 (!%p1634_p8), %s1690_s19, 7  ;;  %s256_s13 = scalar_lea.sflag (!%p1634_p8), [#allocation3], %s1690_s19 }
  0x29   : > { %s1696_s26 = scalar_lea.vmem (!%p1634_p8), [#allocation2], %s1103_s12 }
  0x2c   : > { %1524 = dma.done.wait (%p1621_p4), %s256_s13, 2048  }
  0x2d   : > { %1526 = vsyncadd (%p1621_p4), %s256_s13, 4294965248 }
  0x2e   : > { %1528 = dma.done.wait (%p45_p1), [#allocation6], 1024  }
  0x2f   : > { %1530 = vsyncadd (%p45_p1), [#allocation6], 4294966272  ;;  %v1235_v0 = vld [vmem:[#allocation5 + $0x38] sm:$0xff]  ;;  %v1234_v1 = vld [vmem:[#allocation5 + $0x30] sm:$0xff]  ;;  %s1740_s14 = scalar_lea.vmem [#allocation7], %s1103_s12  ;;  %s1106_s15 = sshll.u32 %s1612_s25, 5 }
  0x30   : > { %510 = vmatpush.bf16.msra.mxu0 %v1235_v0  ;;  %1332 = vmatpush.bf16.msra.mxu1 %v1235_v0  ;;  %v1233_v2 = vld [vmem:[#allocation5 + $0x28] sm:$0xff]  ;;  %v1232_v3 = vld [vmem:[#allocation5 + $0x20] sm:$0xff]  ;;  %v1231_v4 = vld [vmem:[#allocation5 + $0x18] sm:$0xff]  ;;  %p307_p1 = scmp.lt.s32.totalorder %s1106_s15, 63  ;;  %vm699_vm0 = vcmask 7168   ;;  %s951_s10 = sshll.u32 %s1740_s14, 4  ;;  %s952_s10 = int_to_ptr.vmem [resolvable:$true] %s951_s10 }
  0x31   : > { %1334 = vmatpush.bf16.msra.mxu3 %v1235_v0  ;;  %1333 = vmatpush.bf16.msra.mxu2 %v1235_v0  ;;  %v1230_v5 = vld [vmem:[#allocation5 + $0x10] sm:$0xff]  ;;  %v1229_v6 = vld [vmem:[#allocation5 + $0x8] sm:$0xff]  ;;  %v1228_v7 = vld [vmem:[#allocation5] sm:$0xff]  ;;  %s1499_s9 = scalar_lea.hbm %s2053_s4, 256 }
  0x32   : > { %v1212_v8 = vld [vmem:[%s1696_s26] sm:$0xff]  ;;  %v1213_v12 = vld [vmem:[%s1696_s26 + $0x8] sm:$0xff]  ;;  %v1214_v16 = vld [vmem:[%s1696_s26 + $0x10] sm:$0xff]  ;;  %s2071_s15 = smov (!%p307_p1, %s1106_s15), 63 }
  0x33   : > { %v1216_v9 = vld [vmem:[%s1696_s26 + $0x20] sm:$0xff]  ;;  %v1217_v13 = vld [vmem:[%s1696_s26 + $0x28] sm:$0xff]  ;;  %v1218_v17 = vld [vmem:[%s1696_s26 + $0x30] sm:$0xff]  ;;  %s1107_s20 = sshll.u32 %s2071_s15, 3 }
  0x34   : > { %511 = vmatpush.bf16.msra.mxu0 %v1234_v1  ;;  %1335 = vmatpush.bf16.msra.mxu1 %v1234_v1  ;;  %v1224_v10 = vld [vmem:[%s1696_s26 + $0x60] sm:$0xff]  ;;  %v1225_v14 = vld [vmem:[%s1696_s26 + $0x68] sm:$0xff]  ;;  %v1226_v18 = vld [vmem:[%s1696_s26 + $0x70] sm:$0xff]  ;;  %s1844_s18 = scalar_lea.vmem %s2055_s6, %s1107_s20  ;;  %s1849_s13 = scalar_lea.vmem %s2054_s5, %s1107_s20 }
  0x35   : > { %1337 = vmatpush.bf16.msra.mxu3 %v1234_v1  ;;  %1336 = vmatpush.bf16.msra.mxu2 %v1234_v1  ;;  %v1220_v11 = vld [vmem:[%s1696_s26 + $0x40] sm:$0xff]  ;;  %v1221_v15 = vld [vmem:[%s1696_s26 + $0x48] sm:$0xff]  ;;  %v1222_v19 = vld [vmem:[%s1696_s26 + $0x50] sm:$0xff] }
  0x36   : > { %v1215_v20 = vld [vmem:[%s1696_s26 + $0x18] sm:$0xff]  ;;  %v1725_v24 = vld [vmem:[%s2052_s3] ss:$0 sm:$0xff] }
  0x37   : > { %v1219_v21 = vld [vmem:[%s1696_s26 + $0x38] sm:$0xff]  ;;  %v1730_v25 = vld [vmem:[%s2051_s2] ss:$0 sm:$0xff] }
  0x38   : > { %512 = vmatpush.bf16.msra.mxu0 %v1233_v2  ;;  %1338 = vmatpush.bf16.msra.mxu1 %v1233_v2  ;;  %v1223_v22 = vld [vmem:[%s1696_s26 + $0x58] sm:$0xff] }
  0x39   : > { %1340 = vmatpush.bf16.msra.mxu3 %v1233_v2  ;;  %1339 = vmatpush.bf16.msra.mxu2 %v1233_v2  ;;  %v1227_v23 = vld [vmem:[%s1696_s26 + $0x78] sm:$0xff]  ;;  %s1236_s26 = sshll.u32 %s1612_s25, 7  ;;  %s929_s25 = scalar_lea.sflag [#allocation4], %s1690_s19 }
  0x3a   : > { %s950_s7 = scalar_lea.hbm %s2053_s4, %s1236_s26 }
  0x3b   : > { %s953_s15 = sshll.u32 %s950_s7, 4  ;;  %s954_s15 = int_to_ptr.hbm [resolvable:$true] %s953_s15 }
  0x3c   : > { %513 = vmatpush.bf16.msra.mxu0 %v1232_v3  ;;  %1341 = vmatpush.bf16.msra.mxu1 %v1232_v3 }
  0x3d   : > { %1343 = vmatpush.bf16.msra.mxu3 %v1232_v3  ;;  %1342 = vmatpush.bf16.msra.mxu2 %v1232_v3 }
  0x40   : > { %514 = vmatpush.bf16.msra.mxu0 %v1231_v4  ;;  %1344 = vmatpush.bf16.msra.mxu1 %v1231_v4 }
  0x41   : > { %1346 = vmatpush.bf16.msra.mxu3 %v1231_v4  ;;  %1345 = vmatpush.bf16.msra.mxu2 %v1231_v4 }
  0x44   : > { %515 = vmatpush.bf16.msra.mxu0 %v1230_v5  ;;  %1347 = vmatpush.bf16.msra.mxu1 %v1230_v5 }
  0x45   : > { %1349 = vmatpush.bf16.msra.mxu3 %v1230_v5  ;;  %1348 = vmatpush.bf16.msra.mxu2 %v1230_v5 }
  0x48   : > { %516 = vmatpush.bf16.msra.mxu0 %v1229_v6  ;;  %1350 = vmatpush.bf16.msra.mxu1 %v1229_v6 }
  0x49   : > { %1352 = vmatpush.bf16.msra.mxu3 %v1229_v6  ;;  %1351 = vmatpush.bf16.msra.mxu2 %v1229_v6 }
  0x4c   : > { %517 = vmatpush.bf16.msra.mxu0 %v1228_v7  ;;  %1353 = vmatpush.bf16.msra.mxu1 %v1228_v7 }
  0x4d   : > { %1355 = vmatpush.bf16.msra.mxu3 %v1228_v7  ;;  %1354 = vmatpush.bf16.msra.mxu2 %v1228_v7 }
  0x4f   : > { %518 = vmatmul.bf16.vlgmr.msra.gmra.mxu0 %v1212_v8  ;;  %538 = vmatmul.bf16.vlgmr.msra.gmra.mxu1 %v1216_v9 }
  0x50   : > { %578 = vmatmul.bf16.vlgmr.msra.gmra.mxu3 %v1224_v10  ;;  %558 = vmatmul.bf16.vlgmr.msra.gmra.mxu2 %v1220_v11 }
  0x5f   : > { %523 = vmatmul.bf16.gmra.mxu0 %v1213_v12  ;;  %543 = vmatmul.bf16.gmra.mxu1 %v1217_v13 }
  0x60   : > { %583 = vmatmul.bf16.gmra.mxu3 %v1225_v14  ;;  %563 = vmatmul.bf16.gmra.mxu2 %v1221_v15 }
  0x6f   : > { %528 = vmatmul.bf16.gmra.mxu0 %v1214_v16  ;;  %548 = vmatmul.bf16.gmra.mxu1 %v1218_v17 }
  0x70   : > { %588 = vmatmul.bf16.gmra.mxu3 %v1226_v18  ;;  %568 = vmatmul.bf16.gmra.mxu2 %v1222_v19 }
  0x7f   : > { %533 = vmatmul.bf16.gmra.mxu0 %v1215_v20  ;;  %553 = vmatmul.bf16.gmra.mxu1 %v1219_v21 }
  0x80   : > { %573 = vmatmul.bf16.gmra.mxu2 %v1223_v22  ;;  %593 = vmatmul.bf16.gmra.mxu3 %v1227_v23 }
  0xcc   : > { %v519_v26 = vpop.f32.mrf.mxu0  ;;  %v539_v27 = vpop.f32.mrf.mxu1 }
  0xcd   : > { %v744_v28 = vmul.f32 %v1725_v24, %v539_v27  ;;  %v611_v29 = vmul.f32 %v1730_v25, %v539_v27  ;;  %v603_v30 = vmul.f32 %v1730_v25, %v519_v26  ;;  %v736_v39 = vmul.f32 %v1725_v24, %v519_v26 }
  0xcf   : > { %784 = vadd.xlane.f32.xlu1 %v744_v28  ;;  %651 = vadd.xlane.f32.xlu2 %v611_v29 }
  0xd0   : > { %635 = vadd.xlane.f32.xlu0 %v603_v30 }
  0xd3   : > { %v579_v31 = vpop.f32.mrf.mxu3  ;;  %v559_v32 = vpop.f32.mrf.mxu2 }
  0xd4   : > { %v521_v33 = vpop.f32.mrf.mxu0  ;;  %v541_v34 = vpop.f32.mrf.mxu1  ;;  %v619_v35 = vmul.f32 %v1730_v25, %v559_v32  ;;  %v627_v36 = vmul.f32 %v1730_v25, %v579_v31  ;;  %v752_v44 = vmul.f32 %v1725_v24, %v559_v32  ;;  %v760_v48 = vmul.f32 %v1725_v24, %v579_v31 }
  0xd5   : > { %v1240_v37 = vpack.c.bf16 %v521_v33, %v519_v26  ;;  %v1260_v38 = vpack.c.bf16 %v541_v34, %v539_v27  ;;  %v745_v54 = vmul.f32 %v1725_v24, %v541_v34  ;;  %v604_v57 = vmul.f32 %v1730_v25, %v521_v33 }
  0xd6   : > { %v612_v0 = vmul.f32 %v1730_v25, %v541_v34  ;;  %v737_v3 = vmul.f32 %v1725_v24, %v521_v33 }
  0xd7   : > { %1241 = vst [vmem:[%s1740_s14] sm:$0xff] %v1240_v37   ;;  %667 = vadd.xlane.f32.xlu1 %v619_v35  ;;  %768 = vadd.xlane.f32.xlu2 %v736_v39 }
  0xd8   : > { %1320 = vst [vmem:[%s1740_s14 + $0x20] sm:$0xff] %v1260_v38   ;;  %683 = vadd.xlane.f32.xlu0 %v627_v36 }
  0xdb   : > { %v581_v40 = vpop.f32.mrf.mxu3  ;;  %v561_v41 = vpop.f32.mrf.mxu2 }
  0xdc   : > { %v1300_v42 = vpack.c.bf16 %v581_v40, %v579_v31  ;;  %v1280_v43 = vpack.c.bf16 %v561_v41, %v559_v32  ;;  %v524_v45 = vpop.f32.mrf.mxu0  ;;  %v544_v46 = vpop.f32.mrf.mxu1  ;;  %v628_v47 = vmul.f32 %v1730_v25, %v581_v40  ;;  %v753_v53 = vmul.f32 %v1725_v24, %v561_v41 }
  0xdd   : > { %v605_v58 = vmul.f32 %v1730_v25, %v524_v45  ;;  %v620_v63 = vmul.f32 %v1730_v25, %v561_v41  ;;  %v613_v2 = vmul.f32 %v1730_v25, %v544_v46  ;;  %v738_v7 = vmul.f32 %v1725_v24, %v524_v45 }
  0xde   : > { %1328 = vst [vmem:[%s1740_s14 + $0x60] sm:$0xff] %v1300_v42   ;;  %v761_v8 = vmul.f32 %v1725_v24, %v581_v40  ;;  %v746_v16 = vmul.f32 %v1725_v24, %v544_v46 }
  0xdf   : > { %1324 = vst [vmem:[%s1740_s14 + $0x40] sm:$0xff] %v1280_v43   ;;  %685 = vadd.xlane.f32.xlu1 %v628_v47  ;;  %816 = vadd.xlane.f32.xlu2 %v760_v48 }
  0xe0   : > { %800 = vadd.xlane.f32.xlu0 %v752_v44 }
  0xe3   : > { %v584_v49 = vpop.f32.mrf.mxu3  ;;  %v564_v50 = vpop.f32.mrf.mxu2 }
  0xe4   : > { %v526_v51 = vpop.f32.mrf.mxu0  ;;  %v1749_v52 = vpop.f32.mrf.mxu1  ;;  %v629_v1 = vmul.f32 %v1730_v25, %v584_v49  ;;  %v754_v6 = vmul.f32 %v1725_v24, %v564_v50  ;;  %v762_v15 = vmul.f32 %v1725_v24, %v584_v49  ;;  %v621_v22 = vmul.f32 %v1730_v25, %v564_v50 }
  0xe5   : > { %v1245_v55 = vpack.c.bf16 %v526_v51, %v524_v45  ;;  %v1265_v56 = vpack.c.bf16 %v1749_v52, %v544_v46  ;;  %v614_v14 = vmul.f32 %v1730_v25, %v1749_v52  ;;  %v739_v20 = vmul.f32 %v1725_v24, %v526_v51 }
  0xe6   : > { %v606_v21 = vmul.f32 %v1730_v25, %v526_v51  ;;  %v747_v28 = vmul.f32 %v1725_v24, %v1749_v52 }
  0xe7   : > { %802 = vadd.xlane.f32.xlu1 %v753_v53  ;;  %786 = vadd.xlane.f32.xlu2 %v745_v54  ;;  %1317 = vst [vmem:[%s1740_s14 + $0x8] sm:$0xff] %v1245_v55  }
  0xe8   : > { %637 = vadd.xlane.f32.xlu0 %v604_v57  ;;  %1321 = vst [vmem:[%s1740_s14 + $0x28] sm:$0xff] %v1265_v56  }
  0xeb   : > { %v586_v59 = vpop.f32.mrf.mxu3  ;;  %v566_v60 = vpop.f32.mrf.mxu2 }
  0xec   : > { %v1305_v61 = vpack.c.bf16 %v586_v59, %v584_v49  ;;  %v1285_v62 = vpack.c.bf16 %v566_v60, %v564_v50  ;;  %v529_v4 = vpop.f32.mrf.mxu0  ;;  %v549_v5 = vpop.f32.mrf.mxu1  ;;  %v763_v27 = vmul.f32 %v1725_v24, %v586_v59  ;;  %v630_v29 = vmul.f32 %v1730_v25, %v586_v59 }
  0xed   : > { %v607_v30 = vmul.f32 %v1730_v25, %v529_v4  ;;  %v622_v31 = vmul.f32 %v1730_v25, %v566_v60  ;;  %v755_v32 = vmul.f32 %v1725_v24, %v566_v60  ;;  %v748_v34 = vmul.f32 %v1725_v24, %v549_v5 }
  0xee   : > { %1329 = vst [vmem:[%s1740_s14 + $0x68] sm:$0xff] %v1305_v61   ;;  %v615_v35 = vmul.f32 %v1730_v25, %v549_v5  ;;  %v740_v42 = vmul.f32 %v1725_v24, %v529_v4 }
  0xef   : > { %669 = vadd.xlane.f32.xlu2 %v620_v63  ;;  %639 = vadd.xlane.f32.xlu1 %v605_v58  ;;  %1325 = vst [vmem:[%s1740_s14 + $0x48] sm:$0xff] %v1285_v62  }
  0xf0   : > { %653 = vadd.xlane.f32.xlu0 %v612_v0 }
  0xf3   : > { %v589_v13 = vpop.f32.mrf.mxu3  ;;  %v569_v17 = vpop.f32.mrf.mxu2 }
  0xf4   : > { %v1768_v9 = vpop.f32.mrf.mxu0  ;;  %v1770_v10 = vpop.f32.mrf.mxu1  ;;  %v631_v33 = vmul.f32 %v1730_v25, %v589_v13  ;;  %v756_v38 = vmul.f32 %v1725_v24, %v569_v17  ;;  %v623_v39 = vmul.f32 %v1730_v25, %v569_v17  ;;  %v764_v49 = vmul.f32 %v1725_v24, %v589_v13 }
  0xf5   : > { %v1250_v11 = vpack.c.bf16 %v1768_v9, %v529_v4  ;;  %v1270_v12 = vpack.c.bf16 %v1770_v10, %v549_v5  ;;  %v616_v47 = vmul.f32 %v1730_v25, %v1770_v10  ;;  %v608_v48 = vmul.f32 %v1730_v25, %v1768_v9 }
  0xf6   : > { %v741_v54 = vmul.f32 %v1725_v24, %v1768_v9  ;;  %v749_v56 = vmul.f32 %v1725_v24, %v1770_v10 }
  0xf7   : > { %687 = vadd.xlane.f32.xlu2 %v629_v1  ;;  %655 = vadd.xlane.f32.xlu1 %v613_v2  ;;  %1318 = vst [vmem:[%s1740_s14 + $0x10] sm:$0xff] %v1250_v11  }
  0xf8   : > { %770 = vadd.xlane.f32.xlu0 %v737_v3  ;;  %1322 = vst [vmem:[%s1740_s14 + $0x30] sm:$0xff] %v1270_v12  }
  0xfb   : > { %v1780_v18 = vpop.f32.mrf.mxu3  ;;  %v1787_v23 = vpop.f32.mrf.mxu2 }
  0xfc   : > { %v1310_v19 = vpack.c.bf16 %v1780_v18, %v589_v13  ;;  %v1290_v26 = vpack.c.bf16 %v1787_v23, %v569_v17  ;;  %v1801_v36 = vpop.f32.mrf.mxu0  ;;  %v554_v37 = vpop.f32.mrf.mxu1  ;;  %v632_v55 = vmul.f32 %v1730_v25, %v1780_v18  ;;  %v757_v61 = vmul.f32 %v1725_v24, %v1787_v23 }
  0xfd   : > { %v750_v60 = vmul.f32 %v1725_v24, %v554_v37  ;;  %v624_v62 = vmul.f32 %v1730_v25, %v1787_v23  ;;  %v617_v3 = vmul.f32 %v1730_v25, %v554_v37  ;;  %v609_v4 = vmul.f32 %v1730_v25, %v1801_v36 }
  0xfe   : > { %1330 = vst [vmem:[%s1740_s14 + $0x70] sm:$0xff] %v1310_v19   ;;  %v742_v9 = vmul.f32 %v1725_v24, %v1801_v36 }
  0xff   : > { %804 = vadd.xlane.f32.xlu2 %v754_v6  ;;  %772 = vadd.xlane.f32.xlu1 %v738_v7  ;;  %1326 = vst [vmem:[%s1740_s14 + $0x50] sm:$0xff] %v1290_v26  }
 0x100   : > { %818 = vadd.xlane.f32.xlu0 %v761_v8 }
 0x103   : > { %v1813_v45 = vpop.f32.mrf.mxu2  ;;  %v1815_v46 = vpop.f32.mrf.mxu3 }
 0x104   : > { %v1805_v40 = vpop.f32.mrf.mxu0  ;;  %v1807_v41 = vpop.f32.mrf.mxu1  ;;  %v625_v2 = vmul.f32 %v1730_v25, %v1813_v45  ;;  %v633_v8 = vmul.f32 %v1730_v25, %v1815_v46 }
 0x105   : > { %v1255_v43 = vpack.c.bf16 %v1805_v40, %v1801_v36  ;;  %v1275_v44 = vpack.c.bf16 %v1807_v41, %v554_v37  ;;  %v610_v10 = vmul.f32 %v1730_v25, %v1805_v40  ;;  %v618_v23 = vmul.f32 %v1730_v25, %v1807_v41 }
 0x107   : > { %657 = vadd.xlane.f32.xlu2 %v614_v14  ;;  %820 = vadd.xlane.f32.xlu1 %v762_v15  ;;  %1319 = vst [vmem:[%s1740_s14 + $0x18] sm:$0xff] %v1255_v43   ;;  %v751_v14 = vmul.f32 %v1725_v24, %v1807_v41 }
 0x108   : > { %788 = vadd.xlane.f32.xlu0 %v746_v16  ;;  %1323 = vst [vmem:[%s1740_s14 + $0x38] sm:$0xff] %v1275_v44   ;;  %v758_v16 = vmul.f32 %v1725_v24, %v1813_v45 }
 0x10b   : > { %v1825_v50 = vpop.f32.mrf.mxu2  ;;  %v1827_v51 = vpop.f32.mrf.mxu3 }
 0x10c   : > { %v1295_v52 = vpack.c.bf16 %v1825_v50, %v1813_v45  ;;  %v1315_v53 = vpack.c.bf16 %v1827_v51, %v1815_v46  ;;  %v634_v15 = vmul.f32 %v1730_v25, %v1827_v51 }
 0x10e   : > { %1327 = vst [vmem:[%s1740_s14 + $0x58] sm:$0xff] %v1295_v52  }
 0x10f   : > { %774 = vadd.xlane.f32.xlu2 %v739_v20  ;;  %641 = vadd.xlane.f32.xlu1 %v606_v21  ;;  %1331 = vst [vmem:[%s1740_s14 + $0x78] sm:$0xff] %v1315_v53   ;;  %v626_v21 = vmul.f32 %v1730_v25, %v1825_v50  ;;  %v766_v25 = vmul.f32 %v1725_v24, %v1815_v46  ;;  %s1493_s14 = sshra.s32 %s954_s15, 4  ;;  %s1494_s14 = int_to_ptr.hbm [resolvable:$true] %s1493_s14 }
 0x110   : > { %671 = vadd.xlane.f32.xlu0 %v621_v22  ;;  %v759_v22 = vmul.f32 %v1725_v24, %v1825_v50  ;;  %s1495_s20 = scalar_lea.hbm %s1494_s14, 128  ;;  %p1500_p9 = scmp.lt.s32.totalorder %s1494_s14, %s2053_s4 }
 0x111   : > { %p1496_p4 = scmp.ne.s32.totalorder %s1494_s14, %s1495_s20  ;;  %p1501_p2 = scmp.lt.s32.totalorder %s1499_s9, %s1495_s20 }
 0x113   : > { %p1497_p8 = pnand %p1496_p4, %p1660_p3  ;;  %p1502_p10 = por %p1501_p2, %p1500_p9 }
 0x115   : > { %p1498_p11 = pneg %p1497_p8 }
 0x117   : > { %822 = vadd.xlane.f32.xlu2 %v763_v27  ;;  %790 = vadd.xlane.f32.xlu1 %v747_v28  ;;  %p1503_p12 = pnand %p1502_p10, %p1498_p11 }
 0x118   : > { %689 = vadd.xlane.f32.xlu0 %v630_v29  ;;  %v765_v29 = vmul.f32 %v1725_v24, %v1780_v18 }
 0x11f   : > { %673 = vadd.xlane.f32.xlu1 %v622_v31  ;;  %643 = vadd.xlane.f32.xlu2 %v607_v30  ;;  %v743_v30 = vmul.f32 %v1725_v24, %v1805_v40 }
 0x120   : > { %806 = vadd.xlane.f32.xlu0 %v755_v32 }
 0x127   : > { %691 = vadd.xlane.f32.xlu1 %v631_v33  ;;  %792 = vadd.xlane.f32.xlu2 %v748_v34 }
 0x128   : > { %659 = vadd.xlane.f32.xlu0 %v615_v35 }
 0x12f   : > { %808 = vadd.xlane.f32.xlu1 %v756_v38  ;;  %675 = vadd.xlane.f32.xlu2 %v623_v39 }
 0x130   : > { %776 = vadd.xlane.f32.xlu0 %v740_v42 }
 0x137   : > { %661 = vadd.xlane.f32.xlu1 %v616_v47  ;;  %645 = vadd.xlane.f32.xlu2 %v608_v48 }
 0x138   : > { %824 = vadd.xlane.f32.xlu0 %v764_v49 }
 0x13f   : > { %778 = vadd.xlane.f32.xlu1 %v741_v54  ;;  %693 = vadd.xlane.f32.xlu2 %v632_v55 }
 0x140   : > { %794 = vadd.xlane.f32.xlu0 %v749_v56 }
 0x142   : > { %v785_v57 = vpop.xlane.xlu1 %784  ;;  %v652_v58 = vpop.xlane.xlu2 %651 }
 0x143   : > { %840 = vst.msk [vmem:[%s1844_s18 + $0x40] sm:$0xff] %vm699_vm0, %v785_v57  ;;  %v636_v59 = vpop.xlane.xlu0 %635 }
 0x144   : > { %708 = vst.msk [vmem:[%s1849_s13 + $0x40] sm:$0xff] %vm699_vm0, %v652_v58 }
 0x145   : > { %700 = vst.msk [vmem:[%s1849_s13] sm:$0xff] %vm699_vm0, %v636_v59 }
 0x147   : > { %796 = vadd.xlane.f32.xlu1 %v750_v60  ;;  %810 = vadd.xlane.f32.xlu2 %v757_v61 }
 0x148   : > { %677 = vadd.xlane.f32.xlu0 %v624_v62 }
 0x14a   : > { %v668_v63 = vpop.xlane.xlu1 %667  ;;  %v769_v0 = vpop.xlane.xlu2 %768 }
 0x14b   : > { %716 = vst.msk [vmem:[%s1849_s13 + $0x80] sm:$0xff] %vm699_vm0, %v668_v63  ;;  %v684_v1 = vpop.xlane.xlu0 %683 }
 0x14c   : > { %832 = vst.msk [vmem:[%s1844_s18] sm:$0xff] %vm699_vm0, %v769_v0 }
 0x14d   : > { %724 = vst.msk [vmem:[%s1849_s13 + $0xc0] sm:$0xff] %vm699_vm0, %v684_v1 }
 0x14f   : > { %679 = vadd.xlane.f32.xlu1 %v625_v2  ;;  %663 = vadd.xlane.f32.xlu2 %v617_v3 }
 0x150   : > { %647 = vadd.xlane.f32.xlu0 %v609_v4 }
 0x152   : > { %v686_v5 = vpop.xlane.xlu1 %685  ;;  %v817_v6 = vpop.xlane.xlu2 %816 }
 0x153   : > { %725 = vst.msk [vmem:[%s1849_s13 + $0xc8] sm:$0xff] %vm699_vm0, %v686_v5  ;;  %v801_v7 = vpop.xlane.xlu0 %800 }
 0x154   : > { %856 = vst.msk [vmem:[%s1844_s18 + $0xc0] sm:$0xff] %vm699_vm0, %v817_v6 }
 0x155   : > { %848 = vst.msk [vmem:[%s1844_s18 + $0x80] sm:$0xff] %vm699_vm0, %v801_v7 }
 0x157   : > { %780 = vadd.xlane.f32.xlu2 %v742_v9  ;;  %649 = vadd.xlane.f32.xlu1 %v610_v10 }
 0x158   : > { %695 = vadd.xlane.f32.xlu0 %v633_v8 }
 0x15a   : > { %v803_v11 = vpop.xlane.xlu1 %802  ;;  %v787_v12 = vpop.xlane.xlu2 %786 }
 0x15b   : > { %849 = vst.msk [vmem:[%s1844_s18 + $0x88] sm:$0xff] %vm699_vm0, %v803_v11  ;;  %v638_v13 = vpop.xlane.xlu0 %637 }
 0x15c   : > { %841 = vst.msk [vmem:[%s1844_s18 + $0x48] sm:$0xff] %vm699_vm0, %v787_v12 }
 0x15d   : > { %701 = vst.msk [vmem:[%s1849_s13 + $0x8] sm:$0xff] %vm699_vm0, %v638_v13 }
 0x15f   : > { %798 = vadd.xlane.f32.xlu2 %v751_v14  ;;  %697 = vadd.xlane.f32.xlu1 %v634_v15 }
 0x160   : > { %812 = vadd.xlane.f32.xlu0 %v758_v16 }
 0x162   : > { %v670_v17 = vpop.xlane.xlu2 %669  ;;  %v640_v19 = vpop.xlane.xlu1 %639 }
 0x163   : > { %717 = vst.msk [vmem:[%s1849_s13 + $0x88] sm:$0xff] %vm699_vm0, %v670_v17  ;;  %v654_v20 = vpop.xlane.xlu0 %653 }
 0x164   : > { %709 = vst.msk [vmem:[%s1849_s13 + $0x48] sm:$0xff] %vm699_vm0, %v654_v20 }
 0x165   : > { %702 = vst.msk [vmem:[%s1849_s13 + $0x10] sm:$0xff] %vm699_vm0, %v640_v19 }
 0x167   : > { %681 = vadd.xlane.f32.xlu2 %v626_v21  ;;  %814 = vadd.xlane.f32.xlu1 %v759_v22 }
 0x168   : > { %665 = vadd.xlane.f32.xlu0 %v618_v23 }
 0x16a   : > { %v688_v26 = vpop.xlane.xlu2 %687  ;;  %v656_v27 = vpop.xlane.xlu1 %655 }
 0x16b   : > { %726 = vst.msk [vmem:[%s1849_s13 + $0xd0] sm:$0xff] %vm699_vm0, %v688_v26  ;;  %v771_v28 = vpop.xlane.xlu0 %770 }
 0x16c   : > { %833 = vst.msk [vmem:[%s1844_s18 + $0x8] sm:$0xff] %vm699_vm0, %v771_v28 }
 0x16d   : > { %710 = vst.msk [vmem:[%s1849_s13 + $0x50] sm:$0xff] %vm699_vm0, %v656_v27 }
 0x16f   : > { %828 = vadd.xlane.f32.xlu2 %v766_v25  ;;  %826 = vadd.xlane.f32.xlu1 %v765_v29 }
 0x170   : > { %1506 = shalt.err (!%p1503_p12)
}
 0x171   : > { %s1554_s19 = smov 64   ;;  %s1555_s27 = smov 4   ;;  %782 = vadd.xlane.f32.xlu0 %v743_v30  ;;  %v767_v33 = vmul.f32 %v1725_v24, %v1827_v51 }
 0x172   : > { %1362 = dma.vmem_to_hbm [thread:$0]  (%p1660_p3), %s952_s10, 2048, %s954_s15, %s929_s25, %s1554_s19, %s1554_s19, %s1555_s27   ;;  %v805_v18 = vpop.xlane.xlu2 %804  ;;  %v773_v31 = vpop.xlane.xlu1 %772 }
 0x173   : > { %850 = vst.msk [vmem:[%s1844_s18 + $0x90] sm:$0xff] %vm699_vm0, %v805_v18  ;;  %v819_v32 = vpop.xlane.xlu0 %818 }
 0x174   : > { %857 = vst.msk [vmem:[%s1844_s18 + $0xc8] sm:$0xff] %vm699_vm0, %v819_v32 }
 0x175   : > { %834 = vst.msk [vmem:[%s1844_s18 + $0x10] sm:$0xff] %vm699_vm0, %v773_v31 }
 0x179   : > { %830 = vadd.xlane.f32.xlu0 %v767_v33 }
 0x17a   : > { %v658_v34 = vpop.xlane.xlu2 %657  ;;  %v821_v35 = vpop.xlane.xlu1 %820 }
 0x17b   : > { %711 = vst.msk [vmem:[%s1849_s13 + $0x58] sm:$0xff] %vm699_vm0, %v658_v34  ;;  %v789_v36 = vpop.xlane.xlu0 %788 }
 0x17c   : > { %842 = vst.msk [vmem:[%s1844_s18 + $0x50] sm:$0xff] %vm699_vm0, %v789_v36 }
 0x17d   : > { %858 = vst.msk [vmem:[%s1844_s18 + $0xd0] sm:$0xff] %vm699_vm0, %v821_v35 }
 0x182   : > { %v775_v37 = vpop.xlane.xlu2 %774  ;;  %v642_v38 = vpop.xlane.xlu1 %641 }
 0x183   : > { %v672_v39 = vpop.xlane.xlu0 %671  ;;  %835 = vst.msk [vmem:[%s1844_s18 + $0x18] sm:$0xff] %vm699_vm0, %v775_v37 }
 0x184   : > { %718 = vst.msk [vmem:[%s1849_s13 + $0x90] sm:$0xff] %vm699_vm0, %v672_v39 }
 0x185   : > { %703 = vst.msk [vmem:[%s1849_s13 + $0x18] sm:$0xff] %vm699_vm0, %v642_v38 }
 0x18a   : > { %v823_v24 = vpop.xlane.xlu2 %822  ;;  %v791_v40 = vpop.xlane.xlu1 %790 }
 0x18b   : > { %v690_v41 = vpop.xlane.xlu0 %689  ;;  %859 = vst.msk [vmem:[%s1844_s18 + $0xd8] sm:$0xff] %vm699_vm0, %v823_v24 }
 0x18c   : > { %727 = vst.msk [vmem:[%s1849_s13 + $0xd8] sm:$0xff] %vm699_vm0, %v690_v41 }
 0x18d   : > { %843 = vst.msk [vmem:[%s1844_s18 + $0x58] sm:$0xff] %vm699_vm0, %v791_v40 }
 0x192   : > { %v674_v42 = vpop.xlane.xlu1 %673  ;;  %v644_v43 = vpop.xlane.xlu2 %643 }
 0x193   : > { %v807_v44 = vpop.xlane.xlu0 %806  ;;  %719 = vst.msk [vmem:[%s1849_s13 + $0x98] sm:$0xff] %vm699_vm0, %v674_v42 }
 0x194   : > { %851 = vst.msk [vmem:[%s1844_s18 + $0x98] sm:$0xff] %vm699_vm0, %v807_v44 }
 0x195   : > { %704 = vst.msk [vmem:[%s1849_s13 + $0x20] sm:$0xff] %vm699_vm0, %v644_v43 }
 0x19a   : > { %v692_v45 = vpop.xlane.xlu1 %691  ;;  %v793_v46 = vpop.xlane.xlu2 %792 }
 0x19b   : > { %v660_v47 = vpop.xlane.xlu0 %659  ;;  %728 = vst.msk [vmem:[%s1849_s13 + $0xe0] sm:$0xff] %vm699_vm0, %v692_v45 }
 0x19c   : > { %712 = vst.msk [vmem:[%s1849_s13 + $0x60] sm:$0xff] %vm699_vm0, %v660_v47 }
 0x19d   : > { %844 = vst.msk [vmem:[%s1844_s18 + $0x60] sm:$0xff] %vm699_vm0, %v793_v46 }
 0x1a2   : > { %v809_v48 = vpop.xlane.xlu1 %808  ;;  %v676_v49 = vpop.xlane.xlu2 %675 }
 0x1a3   : > { %852 = vst.msk [vmem:[%s1844_s18 + $0xa0] sm:$0xff] %vm699_vm0, %v809_v48  ;;  %v777_v50 = vpop.xlane.xlu0 %776 }
 0x1a4   : > { %836 = vst.msk [vmem:[%s1844_s18 + $0x20] sm:$0xff] %vm699_vm0, %v777_v50 }
 0x1a5   : > { %720 = vst.msk [vmem:[%s1849_s13 + $0xa0] sm:$0xff] %vm699_vm0, %v676_v49 }
 0x1aa   : > { %v662_v51 = vpop.xlane.xlu1 %661  ;;  %v646_v52 = vpop.xlane.xlu2 %645 }
 0x1ab   : > { %713 = vst.msk [vmem:[%s1849_s13 + $0x68] sm:$0xff] %vm699_vm0, %v662_v51  ;;  %v825_v53 = vpop.xlane.xlu0 %824 }
 0x1ac   : > { %860 = vst.msk [vmem:[%s1844_s18 + $0xe0] sm:$0xff] %vm699_vm0, %v825_v53 }
 0x1ad   : > { %705 = vst.msk [vmem:[%s1849_s13 + $0x28] sm:$0xff] %vm699_vm0, %v646_v52 }
 0x1b2   : > { %v779_v54 = vpop.xlane.xlu1 %778  ;;  %v694_v55 = vpop.xlane.xlu2 %693 }
 0x1b3   : > { %v795_v56 = vpop.xlane.xlu0 %794  ;;  %837 = vst.msk [vmem:[%s1844_s18 + $0x28] sm:$0xff] %vm699_vm0, %v779_v54 }
 0x1b4   : > { %845 = vst.msk [vmem:[%s1844_s18 + $0x68] sm:$0xff] %vm699_vm0, %v795_v56 }
 0x1b5   : > { %729 = vst.msk [vmem:[%s1849_s13 + $0xe8] sm:$0xff] %vm699_vm0, %v694_v55 }
 0x1ba   : > { %v797_v57 = vpop.xlane.xlu1 %796  ;;  %v811_v58 = vpop.xlane.xlu2 %810 }
 0x1bb   : > { %v678_v59 = vpop.xlane.xlu0 %677  ;;  %846 = vst.msk [vmem:[%s1844_s18 + $0x70] sm:$0xff] %vm699_vm0, %v797_v57 }
 0x1bc   : > { %721 = vst.msk [vmem:[%s1849_s13 + $0xa8] sm:$0xff] %vm699_vm0, %v678_v59 }
 0x1bd   : > { %853 = vst.msk [vmem:[%s1844_s18 + $0xa8] sm:$0xff] %vm699_vm0, %v811_v58 }
 0x1c2   : > { %v680_v60 = vpop.xlane.xlu1 %679  ;;  %v664_v61 = vpop.xlane.xlu2 %663 }
 0x1c3   : > { %722 = vst.msk [vmem:[%s1849_s13 + $0xb0] sm:$0xff] %vm699_vm0, %v680_v60  ;;  %v648_v62 = vpop.xlane.xlu0 %647 }
 0x1c4   : > { %714 = vst.msk [vmem:[%s1849_s13 + $0x70] sm:$0xff] %vm699_vm0, %v664_v61 }
 0x1c5   : > { %706 = vst.msk [vmem:[%s1849_s13 + $0x30] sm:$0xff] %vm699_vm0, %v648_v62 }
 0x1ca   : > { %v781_v63 = vpop.xlane.xlu2 %780  ;;  %v650_v0 = vpop.xlane.xlu1 %649 }
 0x1cb   : > { %838 = vst.msk [vmem:[%s1844_s18 + $0x30] sm:$0xff] %vm699_vm0, %v781_v63  ;;  %v696_v1 = vpop.xlane.xlu0 %695 }
 0x1cc   : > { %730 = vst.msk [vmem:[%s1849_s13 + $0xf0] sm:$0xff] %vm699_vm0, %v696_v1 }
 0x1cd   : > { %707 = vst.msk [vmem:[%s1849_s13 + $0x38] sm:$0xff] %vm699_vm0, %v650_v0 }
 0x1d2   : > { %v799_v2 = vpop.xlane.xlu2 %798  ;;  %v698_v3 = vpop.xlane.xlu1 %697 }
 0x1d3   : > { %847 = vst.msk [vmem:[%s1844_s18 + $0x78] sm:$0xff] %vm699_vm0, %v799_v2  ;;  %v813_v4 = vpop.xlane.xlu0 %812 }
 0x1d4   : > { %854 = vst.msk [vmem:[%s1844_s18 + $0xb0] sm:$0xff] %vm699_vm0, %v813_v4 }
 0x1d5   : > { %731 = vst.msk [vmem:[%s1849_s13 + $0xf8] sm:$0xff] %vm699_vm0, %v698_v3 }
 0x1da   : > { %v682_v5 = vpop.xlane.xlu2 %681  ;;  %v815_v6 = vpop.xlane.xlu1 %814 }
 0x1db   : > { %723 = vst.msk [vmem:[%s1849_s13 + $0xb8] sm:$0xff] %vm699_vm0, %v682_v5  ;;  %v666_v7 = vpop.xlane.xlu0 %665 }
 0x1dc   : > { %715 = vst.msk [vmem:[%s1849_s13 + $0x78] sm:$0xff] %vm699_vm0, %v666_v7 }
 0x1dd   : > { %855 = vst.msk [vmem:[%s1844_s18 + $0xb8] sm:$0xff] %vm699_vm0, %v815_v6 }
 0x1e2   : > { %v829_v8 = vpop.xlane.xlu2 %828  ;;  %v827_v9 = vpop.xlane.xlu1 %826 }
 0x1e3   : > { %862 = vst.msk [vmem:[%s1844_s18 + $0xf0] sm:$0xff] %vm699_vm0, %v829_v8 }
 0x1e4   : > { %v783_v10 = vpop.xlane.xlu0 %782  ;;  %861 = vst.msk [vmem:[%s1844_s18 + $0xe8] sm:$0xff] %vm699_vm0, %v827_v9 }
 0x1e5   : > { %839 = vst.msk [vmem:[%s1844_s18 + $0x38] sm:$0xff] %vm699_vm0, %v783_v10 }
 0x1ec   : > { %v831_v11 = vpop.xlane.xlu0 %830 }
 0x1ed   : > { %863 = vst.msk [vmem:[%s1844_s18 + $0xf8] sm:$0xff] %vm699_vm0, %v831_v11 }
 0x1ee PF: > { %s976_s17 = sand.u32 1, %s1537_s21   ;;  %p2065_p3 = scmp.ge.s32.totalorder %s1549_s24, 2 }
 0x1ef   : > { %s977_s13 = scalar_lea.sflag [#allocation4], %s976_s17 }
 0x1f0   : > { %p1373_p13 = pnand %p2065_p3, %p1626_p6 }
 0x1f2   : > { %p1374_p0 = pneg %p1373_p13 }
 0x1f4   : > { %1532 = dma.done.wait (%p1374_p0), %s977_s13, 2048  }
 0x1f5   : > { %1534 = vsyncadd (%p1374_p0), %s977_s13, 4294965248  ;;  %p21_p5 = scmp.ge.s32.totalorder %s1644_s11, 4   ;;  %s2066_s21 = smov %s1541_s22 }
 0x1f6   : > { %s2067_s22 = smov %s1545_s23  ;;  %s2068_s23 = smov %s1656_s16 }
 0x1f7   : > { %s2069_s24 = smov %s1644_s11  ;;  %23 = sbr.rel (!%p21_p5) target bundleno = 6 (0x6), region = 109 }
 0x1fc   :  { %999 = vsyncpa [#allocation3], 1 }
 0x1fd   :  { %1001 = vsyncpa [#allocation3 + $0x1], 1 }
 0x1fe   :  { %1002 = vsyncpa [#allocation6], 1 }
 0x1ff   :  { %1003 = vsyncpa [#allocation4], 1 }
 0x200   :  { %1005 = vsyncpa [#allocation4 + $0x1], 1 }

</bundles_post_ra>
